<compile_context>
chip_gen: v6e
topology: v6e:2x2x1
jax: 0.10.0
libtpu: 0.0.40
codegen_flags: <defaults>
</compile_context>

<pallas_src>
import jax
import jax.numpy as jnp
from jax import lax
from jax.experimental import pallas as pl
from jax.experimental.pallas import tpu as pltpu

# ---- model hyperparameters (small, consistent with the module) ----
VOCAB = 8          # input_size  (embedding num_embeddings / vocab)
EMB = 16           # embedding_size
HIDDEN = 32        # hidden_size
NUM_LAYERS = 2     # num_layers
NUM_CLASS = 8      # num_class
BATCH = 2
SEQ = 8


def rnn_emb_kernel(tok_ref,            # (T*B, 1) int32, time-major flattened token ids
                   emb_ref,            # (V, E)
                   wih0t_ref,          # (E, H)   = W_ih0.T
                   whh0t_ref,          # (H, H)   = W_hh0.T
                   b0_ref,             # (1, H)   = b_ih0 + b_hh0
                   wih1t_ref,          # (H, H)   = W_ih1.T
                   whh1t_ref,          # (H, H)   = W_hh1.T
                   b1_ref,             # (1, H)   = b_ih1 + b_hh1
                   wfct_ref,           # (H, C)   = W_fc.T
                   bfc_ref,            # (1, C)
                   out_ref,            # (T*B, C) time-major logits
                   seq0_ref,           # scratch (T*B, H): layer-0 outputs
                   seq1_ref):          # scratch (T*B, H): layer-1 outputs
    TB = tok_ref.shape[0]
    V, E = emb_ref.shape
    H = whh0t_ref.shape[0]
    B = BATCH
    T = TB // B

    f32 = jnp.float32

    # ---- Embedding lookup as a 2D one-hot matmul (MXU) ----
    iota = lax.broadcasted_iota(jnp.int32, (TB, V), 1)
    onehot = (iota == tok_ref[...]).astype(f32)                           # (T*B, V)
    x_emb = jnp.dot(onehot, emb_ref[...], preferred_element_type=f32)     # (T*B, E)

    # ---- Layer 0: hoisted input projection (time-independent), merged bias ----
    x_proj0 = jnp.dot(x_emb, wih0t_ref[...],
                      preferred_element_type=f32) + b0_ref[...]           # (T*B, H)

    whh0t = whh0t_ref[...]
    h0 = jnp.zeros((B, H), f32)
    for t in range(T):                       # fully unrolled; h0 stays in vregs
        xs = x_proj0[t * B:(t + 1) * B, :]                                 # static slice (B, H)
        h0 = jnp.tanh(xs + jnp.dot(h0, whh0t, preferred_element_type=f32))
        seq0_ref[pl.ds(t * B, B), :] = h0                                  # contiguous row-block

    # ---- Layer 1: hoisted input projection over the whole layer-0 sequence ----
    x_proj1 = jnp.dot(seq0_ref[...], wih1t_ref[...],
                      preferred_element_type=f32) + b1_ref[...]            # (T*B, H)

    whh1t = whh1t_ref[...]
    h1 = jnp.zeros((B, H), f32)
    for t in range(T):
        xs = x_proj1[t * B:(t + 1) * B, :]
        h1 = jnp.tanh(xs + jnp.dot(h1, whh1t, preferred_element_type=f32))
        seq1_ref[pl.ds(t * B, B), :] = h1

    # ---- Linear head: single batched matmul, single store ----
    logits = jnp.dot(seq1_ref[...], wfct_ref[...],
                     preferred_element_type=f32) + bfc_ref[...]            # (T*B, C)
    out_ref[...] = logits.astype(out_ref.dtype)


def model_forward(tok, params):
    """tok: (B, T) int32 token ids; params in PyTorch layout. Returns (B*T, C) f32."""
    B, T = tok.shape
    H, C = HIDDEN, NUM_CLASS

    # Layout plumbing (done once, outside the kernel):
    #   time-major flattened tokens, pre-transposed weights, merged RNN biases.
    tok_tm = tok.T.reshape(T * B, 1).astype(jnp.int32)        # row index = t*B + b
    wih0t = params["wih0"].T                                  # (E, H)
    whh0t = params["whh0"].T                                  # (H, H)
    b0 = params["bih0"] + params["bhh0"]                      # (1, H)
    wih1t = params["wih1"].T                                  # (H, H)
    whh1t = params["whh1"].T                                  # (H, H)
    b1 = params["bih1"] + params["bhh1"]                      # (1, H)
    wfct = params["wfc"].T                                    # (H, C)
    bfc = params["bfc"]                                       # (1, C)

    vmem_spec = pl.BlockSpec(memory_space=pltpu.MemorySpace.VMEM)
    out_tm = pl.pallas_call(
        rnn_emb_kernel,
        out_shape=jax.ShapeDtypeStruct((T * B, C), jnp.float32),
        in_specs=[vmem_spec] * 10,
        out_specs=vmem_spec,
        scratch_shapes=[
            pltpu.VMEM((T * B, H), jnp.float32),   # layer-0 sequence (time-major)
            pltpu.VMEM((T * B, H), jnp.float32),   # layer-1 sequence (time-major)
        ],
    )(tok_tm, params["emb"], wih0t, whh0t, b0, wih1t, whh1t, b1, wfct, bfc)

    # (T, B, C) time-major -> (B, T, C) batch-major -> view(-1, C)
    return jnp.transpose(out_tm.reshape(T, B, C), (1, 0, 2)).reshape(B * T, C)


def ref_forward(tok, params):
    """Pure-JAX reference matching PyTorch semantics (for correctness check)."""
    x = params["emb"][tok]                                   # (B, T, E)
    B, T, _ = x.shape
    layer_ws = [(params["wih0"], params["whh0"], params["bih0"], params["bhh0"]),
                (params["wih1"], params["whh1"], params["bih1"], params["bhh1"])]
    inp = x
    for (wih, whh, bih, bhh) in layer_ws:
        h = jnp.zeros((B, HIDDEN), jnp.float32)
        outs = []
        for t in range(T):
            h = jnp.tanh(inp[:, t, :] @ wih.T + bih + h @ whh.T + bhh)
            outs.append(h)
        inp = jnp.stack(outs, axis=1)                        # (B, T, H)
    logits = inp @ params["wfc"].T + params["bfc"]           # (B, T, C)
    return logits.reshape(-1, NUM_CLASS)


def init_params(key):
    ks = jax.random.split(key, 12)
    s_rnn = 1.0 / jnp.sqrt(HIDDEN)
    s_fc = 1.0 / jnp.sqrt(HIDDEN)
    u = lambda k, shape, s: jax.random.uniform(k, shape, jnp.float32, -s, s)
    return {
        "emb": jax.random.normal(ks[0], (VOCAB, EMB), jnp.float32),
        "wih0": u(ks[1], (HIDDEN, EMB), s_rnn),
        "whh0": u(ks[2], (HIDDEN, HIDDEN), s_rnn),
        "bih0": u(ks[3], (1, HIDDEN), s_rnn),
        "bhh0": u(ks[4], (1, HIDDEN), s_rnn),
        "wih1": u(ks[5], (HIDDEN, HIDDEN), s_rnn),
        "whh1": u(ks[6], (HIDDEN, HIDDEN), s_rnn),
        "bih1": u(ks[7], (1, HIDDEN), s_rnn),
        "bhh1": u(ks[8], (1, HIDDEN), s_rnn),
        "wfc": u(ks[9], (NUM_CLASS, HIDDEN), s_fc),
        "bfc": u(ks[10], (1, NUM_CLASS), s_fc),
    }


if __name__ == "__main__":
    key = jax.random.PRNGKey(0)
    k_tok, k_par = jax.random.split(key)
    tok = jax.random.randint(k_tok, (BATCH, SEQ), 0, VOCAB, dtype=jnp.int32)
    params = init_params(k_par)

    out = model_forward(tok, params)
    out = jax.block_until_ready(out)

    ref = ref_forward(tok, params)
    assert out.shape == (BATCH * SEQ, NUM_CLASS)
    assert jnp.allclose(out, ref, atol=1e-5, rtol=1e-5), \
        f"max err {jnp.max(jnp.abs(out - ref))}"

    print("KERNEL_OK")
</pallas_src>

<mosaic_0001>
module attributes {stable_mosaic.version = 11 : i64} {
  func.func @rnn_emb_kernel(%arg0: memref<16x1xi32, #tpu.memory_space<vmem>>, %arg1: memref<8x16xf32, #tpu.memory_space<vmem>>, %arg2: memref<16x32xf32, #tpu.memory_space<vmem>>, %arg3: memref<32x32xf32, #tpu.memory_space<vmem>>, %arg4: memref<1x32xf32, #tpu.memory_space<vmem>>, %arg5: memref<32x32xf32, #tpu.memory_space<vmem>>, %arg6: memref<32x32xf32, #tpu.memory_space<vmem>>, %arg7: memref<1x32xf32, #tpu.memory_space<vmem>>, %arg8: memref<32x8xf32, #tpu.memory_space<vmem>>, %arg9: memref<1x8xf32, #tpu.memory_space<vmem>>, %arg10: memref<16x8xf32, #tpu.memory_space<vmem>>, %arg11: memref<16x32xf32, #tpu.memory_space<vmem>>, %arg12: memref<16x32xf32, #tpu.memory_space<vmem>>) attributes {dimension_semantics = [], scalar_prefetch = 0 : i64, scratch_operands = 2 : i64, tpu.core_type = #tpu.core_type<tc>} {
    %0 = tpu.iota {dimensions = array<i32: 1>} : vector<16x8xi32>
    %c0 = arith.constant 0 : index
    %c0_0 = arith.constant 0 : index
    %1 = vector.load %arg0[%c0, %c0_0] : memref<16x1xi32, #tpu.memory_space<vmem>>, vector<16x1xi32>
    %2 = vector.broadcast %1 : vector<16x1xi32> to vector<16x8xi32>
    %3 = arith.cmpi eq, %0, %2 : vector<16x8xi32>
    %4 = arith.extui %3 : vector<16x8xi1> to vector<16x8xi32>
    %5 = arith.sitofp %4 : vector<16x8xi32> to vector<16x8xf32>
    %c0_1 = arith.constant 0 : index
    %c0_2 = arith.constant 0 : index
    %6 = vector.load %arg1[%c0_1, %c0_2] : memref<8x16xf32, #tpu.memory_space<vmem>>, vector<8x16xf32>
    %cst = arith.constant dense<0.000000e+00> : vector<16x16xf32>
    %7 = tpu.matmul %5, %6, %cst {dimension_numbers = #tpu.dot_dimension_numbers<[1], [0], [0], [1], [0, 0, 1, 1], [], []>} : vector<16x8xf32>, vector<8x16xf32>, vector<16x16xf32> -> vector<16x16xf32>
    %c0_3 = arith.constant 0 : index
    %c0_4 = arith.constant 0 : index
    %8 = vector.load %arg2[%c0_3, %c0_4] : memref<16x32xf32, #tpu.memory_space<vmem>>, vector<16x32xf32>
    %cst_5 = arith.constant dense<0.000000e+00> : vector<16x32xf32>
    %9 = tpu.matmul %7, %8, %cst_5 {dimension_numbers = #tpu.dot_dimension_numbers<[1], [0], [0], [1], [0, 0, 1, 1], [], []>} : vector<16x16xf32>, vector<16x32xf32>, vector<16x32xf32> -> vector<16x32xf32>
    %c0_6 = arith.constant 0 : index
    %c0_7 = arith.constant 0 : index
    %10 = vector.load %arg4[%c0_6, %c0_7] : memref<1x32xf32, #tpu.memory_space<vmem>>, vector<1x32xf32>
    %11 = vector.broadcast %10 : vector<1x32xf32> to vector<16x32xf32>
    %12 = arith.addf %9, %11 : vector<16x32xf32>
    %c0_8 = arith.constant 0 : index
    %c0_9 = arith.constant 0 : index
    %13 = vector.load %arg3[%c0_8, %c0_9] : memref<32x32xf32, #tpu.memory_space<vmem>>, vector<32x32xf32>
    %cst_10 = arith.constant 0.000000e+00 : f32
    %14 = vector.broadcast %cst_10 : f32 to vector<2x32xf32>
    %15 = vector.extract_strided_slice %12 {offsets = [0, 0], sizes = [2, 32], strides = [1, 1]} : vector<16x32xf32> to vector<2x32xf32>
    %cst_11 = arith.constant dense<0.000000e+00> : vector<2x32xf32>
    %16 = tpu.matmul %14, %13, %cst_11 {dimension_numbers = #tpu.dot_dimension_numbers<[1], [0], [0], [1], [0, 0, 1, 1], [], []>} : vector<2x32xf32>, vector<32x32xf32>, vector<2x32xf32> -> vector<2x32xf32>
    %17 = arith.addf %15, %16 : vector<2x32xf32>
    %18 = math.tanh %17 : vector<2x32xf32>
    %c0_12 = arith.constant 0 : index
    %c0_13 = arith.constant 0 : index
    %19 = vector.load %arg11[%c0_12, %c0_13] : memref<16x32xf32, #tpu.memory_space<vmem>>, vector<2x32xf32>
    tpu.vector_store %arg11[%c0_12, %c0_13], %18 {strides = array<i32>} : memref<16x32xf32, #tpu.memory_space<vmem>>, vector<2x32xf32>,
    %20 = vector.extract_strided_slice %12 {offsets = [2, 0], sizes = [2, 32], strides = [1, 1]} : vector<16x32xf32> to vector<2x32xf32>
    %cst_14 = arith.constant dense<0.000000e+00> : vector<2x32xf32>
    %21 = tpu.matmul %18, %13, %cst_14 {dimension_numbers = #tpu.dot_dimension_numbers<[1], [0], [0], [1], [0, 0, 1, 1], [], []>} : vector<2x32xf32>, vector<32x32xf32>, vector<2x32xf32> -> vector<2x32xf32>
    %22 = arith.addf %20, %21 : vector<2x32xf32>
    %23 = math.tanh %22 : vector<2x32xf32>
    %c2 = arith.constant 2 : index
    %c0_15 = arith.constant 0 : index
    %24 = vector.load %arg11[%c2, %c0_15] : memref<16x32xf32, #tpu.memory_space<vmem>>, vector<2x32xf32>
    tpu.vector_store %arg11[%c2, %c0_15], %23 {strides = array<i32>} : memref<16x32xf32, #tpu.memory_space<vmem>>, vector<2x32xf32>,
    %25 = vector.extract_strided_slice %12 {offsets = [4, 0], sizes = [2, 32], strides = [1, 1]} : vector<16x32xf32> to vector<2x32xf32>
    %cst_16 = arith.constant dense<0.000000e+00> : vector<2x32xf32>
    %26 = tpu.matmul %23, %13, %cst_16 {dimension_numbers = #tpu.dot_dimension_numbers<[1], [0], [0], [1], [0, 0, 1, 1], [], []>} : vector<2x32xf32>, vector<32x32xf32>, vector<2x32xf32> -> vector<2x32xf32>
    %27 = arith.addf %25, %26 : vector<2x32xf32>
    %28 = math.tanh %27 : vector<2x32xf32>
    %c4 = arith.constant 4 : index
    %c0_17 = arith.constant 0 : index
    %29 = vector.load %arg11[%c4, %c0_17] : memref<16x32xf32, #tpu.memory_space<vmem>>, vector<2x32xf32>
    tpu.vector_store %arg11[%c4, %c0_17], %28 {strides = array<i32>} : memref<16x32xf32, #tpu.memory_space<vmem>>, vector<2x32xf32>,
    %30 = vector.extract_strided_slice %12 {offsets = [6, 0], sizes = [2, 32], strides = [1, 1]} : vector<16x32xf32> to vector<2x32xf32>
    %cst_18 = arith.constant dense<0.000000e+00> : vector<2x32xf32>
    %31 = tpu.matmul %28, %13, %cst_18 {dimension_numbers = #tpu.dot_dimension_numbers<[1], [0], [0], [1], [0, 0, 1, 1], [], []>} : vector<2x32xf32>, vector<32x32xf32>, vector<2x32xf32> -> vector<2x32xf32>
    %32 = arith.addf %30, %31 : vector<2x32xf32>
    %33 = math.tanh %32 : vector<2x32xf32>
    %c6 = arith.constant 6 : index
    %c0_19 = arith.constant 0 : index
    %34 = vector.load %arg11[%c6, %c0_19] : memref<16x32xf32, #tpu.memory_space<vmem>>, vector<2x32xf32>
    tpu.vector_store %arg11[%c6, %c0_19], %33 {strides = array<i32>} : memref<16x32xf32, #tpu.memory_space<vmem>>, vector<2x32xf32>,
    %35 = vector.extract_strided_slice %12 {offsets = [8, 0], sizes = [2, 32], strides = [1, 1]} : vector<16x32xf32> to vector<2x32xf32>
    %cst_20 = arith.constant dense<0.000000e+00> : vector<2x32xf32>
    %36 = tpu.matmul %33, %13, %cst_20 {dimension_numbers = #tpu.dot_dimension_numbers<[1], [0], [0], [1], [0, 0, 1, 1], [], []>} : vector<2x32xf32>, vector<32x32xf32>, vector<2x32xf32> -> vector<2x32xf32>
    %37 = arith.addf %35, %36 : vector<2x32xf32>
    %38 = math.tanh %37 : vector<2x32xf32>
    %c8 = arith.constant 8 : index
    %c0_21 = arith.constant 0 : index
    %39 = vector.load %arg11[%c8, %c0_21] : memref<16x32xf32, #tpu.memory_space<vmem>>, vector<2x32xf32>
    tpu.vector_store %arg11[%c8, %c0_21], %38 {strides = array<i32>} : memref<16x32xf32, #tpu.memory_space<vmem>>, vector<2x32xf32>,
    %40 = vector.extract_strided_slice %12 {offsets = [10, 0], sizes = [2, 32], strides = [1, 1]} : vector<16x32xf32> to vector<2x32xf32>
    %cst_22 = arith.constant dense<0.000000e+00> : vector<2x32xf32>
    %41 = tpu.matmul %38, %13, %cst_22 {dimension_numbers = #tpu.dot_dimension_numbers<[1], [0], [0], [1], [0, 0, 1, 1], [], []>} : vector<2x32xf32>, vector<32x32xf32>, vector<2x32xf32> -> vector<2x32xf32>
    %42 = arith.addf %40, %41 : vector<2x32xf32>
    %43 = math.tanh %42 : vector<2x32xf32>
    %c10 = arith.constant 10 : index
    %c0_23 = arith.constant 0 : index
    %44 = vector.load %arg11[%c10, %c0_23] : memref<16x32xf32, #tpu.memory_space<vmem>>, vector<2x32xf32>
    tpu.vector_store %arg11[%c10, %c0_23], %43 {strides = array<i32>} : memref<16x32xf32, #tpu.memory_space<vmem>>, vector<2x32xf32>,
    %45 = vector.extract_strided_slice %12 {offsets = [12, 0], sizes = [2, 32], strides = [1, 1]} : vector<16x32xf32> to vector<2x32xf32>
    %cst_24 = arith.constant dense<0.000000e+00> : vector<2x32xf32>
    %46 = tpu.matmul %43, %13, %cst_24 {dimension_numbers = #tpu.dot_dimension_numbers<[1], [0], [0], [1], [0, 0, 1, 1], [], []>} : vector<2x32xf32>, vector<32x32xf32>, vector<2x32xf32> -> vector<2x32xf32>
    %47 = arith.addf %45, %46 : vector<2x32xf32>
    %48 = math.tanh %47 : vector<2x32xf32>
    %c12 = arith.constant 12 : index
    %c0_25 = arith.constant 0 : index
    %49 = vector.load %arg11[%c12, %c0_25] : memref<16x32xf32, #tpu.memory_space<vmem>>, vector<2x32xf32>
    tpu.vector_store %arg11[%c12, %c0_25], %48 {strides = array<i32>} : memref<16x32xf32, #tpu.memory_space<vmem>>, vector<2x32xf32>,
    %50 = vector.extract_strided_slice %12 {offsets = [14, 0], sizes = [2, 32], strides = [1, 1]} : vector<16x32xf32> to vector<2x32xf32>
    %cst_26 = arith.constant dense<0.000000e+00> : vector<2x32xf32>
    %51 = tpu.matmul %48, %13, %cst_26 {dimension_numbers = #tpu.dot_dimension_numbers<[1], [0], [0], [1], [0, 0, 1, 1], [], []>} : vector<2x32xf32>, vector<32x32xf32>, vector<2x32xf32> -> vector<2x32xf32>
    %52 = arith.addf %50, %51 : vector<2x32xf32>
    %53 = math.tanh %52 : vector<2x32xf32>
    %c14 = arith.constant 14 : index
    %c0_27 = arith.constant 0 : index
    %54 = vector.load %arg11[%c14, %c0_27] : memref<16x32xf32, #tpu.memory_space<vmem>>, vector<2x32xf32>
    tpu.vector_store %arg11[%c14, %c0_27], %53 {strides = array<i32>} : memref<16x32xf32, #tpu.memory_space<vmem>>, vector<2x32xf32>,
    %c0_28 = arith.constant 0 : index
    %c0_29 = arith.constant 0 : index
    %55 = vector.load %arg11[%c0_28, %c0_29] : memref<16x32xf32, #tpu.memory_space<vmem>>, vector<16x32xf32>
    %c0_30 = arith.constant 0 : index
    %c0_31 = arith.constant 0 : index
    %56 = vector.load %arg5[%c0_30, %c0_31] : memref<32x32xf32, #tpu.memory_space<vmem>>, vector<32x32xf32>
    %cst_32 = arith.constant dense<0.000000e+00> : vector<16x32xf32>
    %57 = tpu.matmul %55, %56, %cst_32 {dimension_numbers = #tpu.dot_dimension_numbers<[1], [0], [0], [1], [0, 0, 1, 1], [], []>} : vector<16x32xf32>, vector<32x32xf32>, vector<16x32xf32> -> vector<16x32xf32>
    %c0_33 = arith.constant 0 : index
    %c0_34 = arith.constant 0 : index
    %58 = vector.load %arg7[%c0_33, %c0_34] : memref<1x32xf32, #tpu.memory_space<vmem>>, vector<1x32xf32>
    %59 = vector.broadcast %58 : vector<1x32xf32> to vector<16x32xf32>
    %60 = arith.addf %57, %59 : vector<16x32xf32>
    %c0_35 = arith.constant 0 : index
    %c0_36 = arith.constant 0 : index
    %61 = vector.load %arg6[%c0_35, %c0_36] : memref<32x32xf32, #tpu.memory_space<vmem>>, vector<32x32xf32>
    %cst_37 = arith.constant 0.000000e+00 : f32
    %62 = vector.broadcast %cst_37 : f32 to vector<2x32xf32>
    %63 = vector.extract_strided_slice %60 {offsets = [0, 0], sizes = [2, 32], strides = [1, 1]} : vector<16x32xf32> to vector<2x32xf32>
    %cst_38 = arith.constant dense<0.000000e+00> : vector<2x32xf32>
    %64 = tpu.matmul %62, %61, %cst_38 {dimension_numbers = #tpu.dot_dimension_numbers<[1], [0], [0], [1], [0, 0, 1, 1], [], []>} : vector<2x32xf32>, vector<32x32xf32>, vector<2x32xf32> -> vector<2x32xf32>
    %65 = arith.addf %63, %64 : vector<2x32xf32>
    %66 = math.tanh %65 : vector<2x32xf32>
    %c0_39 = arith.constant 0 : index
    %c0_40 = arith.constant 0 : index
    %67 = vector.load %arg12[%c0_39, %c0_40] : memref<16x32xf32, #tpu.memory_space<vmem>>, vector<2x32xf32>
    tpu.vector_store %arg12[%c0_39, %c0_40], %66 {strides = array<i32>} : memref<16x32xf32, #tpu.memory_space<vmem>>, vector<2x32xf32>,
    %68 = vector.extract_strided_slice %60 {offsets = [2, 0], sizes = [2, 32], strides = [1, 1]} : vector<16x32xf32> to vector<2x32xf32>
    %cst_41 = arith.constant dense<0.000000e+00> : vector<2x32xf32>
    %69 = tpu.matmul %66, %61, %cst_41 {dimension_numbers = #tpu.dot_dimension_numbers<[1], [0], [0], [1], [0, 0, 1, 1], [], []>} : vector<2x32xf32>, vector<32x32xf32>, vector<2x32xf32> -> vector<2x32xf32>
    %70 = arith.addf %68, %69 : vector<2x32xf32>
    %71 = math.tanh %70 : vector<2x32xf32>
    %c2_42 = arith.constant 2 : index
    %c0_43 = arith.constant 0 : index
    %72 = vector.load %arg12[%c2_42, %c0_43] : memref<16x32xf32, #tpu.memory_space<vmem>>, vector<2x32xf32>
    tpu.vector_store %arg12[%c2_42, %c0_43], %71 {strides = array<i32>} : memref<16x32xf32, #tpu.memory_space<vmem>>, vector<2x32xf32>,
    %73 = vector.extract_strided_slice %60 {offsets = [4, 0], sizes = [2, 32], strides = [1, 1]} : vector<16x32xf32> to vector<2x32xf32>
    %cst_44 = arith.constant dense<0.000000e+00> : vector<2x32xf32>
    %74 = tpu.matmul %71, %61, %cst_44 {dimension_numbers = #tpu.dot_dimension_numbers<[1], [0], [0], [1], [0, 0, 1, 1], [], []>} : vector<2x32xf32>, vector<32x32xf32>, vector<2x32xf32> -> vector<2x32xf32>
    %75 = arith.addf %73, %74 : vector<2x32xf32>
    %76 = math.tanh %75 : vector<2x32xf32>
    %c4_45 = arith.constant 4 : index
    %c0_46 = arith.constant 0 : index
    %77 = vector.load %arg12[%c4_45, %c0_46] : memref<16x32xf32, #tpu.memory_space<vmem>>, vector<2x32xf32>
    tpu.vector_store %arg12[%c4_45, %c0_46], %76 {strides = array<i32>} : memref<16x32xf32, #tpu.memory_space<vmem>>, vector<2x32xf32>,
    %78 = vector.extract_strided_slice %60 {offsets = [6, 0], sizes = [2, 32], strides = [1, 1]} : vector<16x32xf32> to vector<2x32xf32>
    %cst_47 = arith.constant dense<0.000000e+00> : vector<2x32xf32>
    %79 = tpu.matmul %76, %61, %cst_47 {dimension_numbers = #tpu.dot_dimension_numbers<[1], [0], [0], [1], [0, 0, 1, 1], [], []>} : vector<2x32xf32>, vector<32x32xf32>, vector<2x32xf32> -> vector<2x32xf32>
    %80 = arith.addf %78, %79 : vector<2x32xf32>
    %81 = math.tanh %80 : vector<2x32xf32>
    %c6_48 = arith.constant 6 : index
    %c0_49 = arith.constant 0 : index
    %82 = vector.load %arg12[%c6_48, %c0_49] : memref<16x32xf32, #tpu.memory_space<vmem>>, vector<2x32xf32>
    tpu.vector_store %arg12[%c6_48, %c0_49], %81 {strides = array<i32>} : memref<16x32xf32, #tpu.memory_space<vmem>>, vector<2x32xf32>,
    %83 = vector.extract_strided_slice %60 {offsets = [8, 0], sizes = [2, 32], strides = [1, 1]} : vector<16x32xf32> to vector<2x32xf32>
    %cst_50 = arith.constant dense<0.000000e+00> : vector<2x32xf32>
    %84 = tpu.matmul %81, %61, %cst_50 {dimension_numbers = #tpu.dot_dimension_numbers<[1], [0], [0], [1], [0, 0, 1, 1], [], []>} : vector<2x32xf32>, vector<32x32xf32>, vector<2x32xf32> -> vector<2x32xf32>
    %85 = arith.addf %83, %84 : vector<2x32xf32>
    %86 = math.tanh %85 : vector<2x32xf32>
    %c8_51 = arith.constant 8 : index
    %c0_52 = arith.constant 0 : index
    %87 = vector.load %arg12[%c8_51, %c0_52] : memref<16x32xf32, #tpu.memory_space<vmem>>, vector<2x32xf32>
    tpu.vector_store %arg12[%c8_51, %c0_52], %86 {strides = array<i32>} : memref<16x32xf32, #tpu.memory_space<vmem>>, vector<2x32xf32>,
    %88 = vector.extract_strided_slice %60 {offsets = [10, 0], sizes = [2, 32], strides = [1, 1]} : vector<16x32xf32> to vector<2x32xf32>
    %cst_53 = arith.constant dense<0.000000e+00> : vector<2x32xf32>
    %89 = tpu.matmul %86, %61, %cst_53 {dimension_numbers = #tpu.dot_dimension_numbers<[1], [0], [0], [1], [0, 0, 1, 1], [], []>} : vector<2x32xf32>, vector<32x32xf32>, vector<2x32xf32> -> vector<2x32xf32>
    %90 = arith.addf %88, %89 : vector<2x32xf32>
    %91 = math.tanh %90 : vector<2x32xf32>
    %c10_54 = arith.constant 10 : index
    %c0_55 = arith.constant 0 : index
    %92 = vector.load %arg12[%c10_54, %c0_55] : memref<16x32xf32, #tpu.memory_space<vmem>>, vector<2x32xf32>
    tpu.vector_store %arg12[%c10_54, %c0_55], %91 {strides = array<i32>} : memref<16x32xf32, #tpu.memory_space<vmem>>, vector<2x32xf32>,
    %93 = vector.extract_strided_slice %60 {offsets = [12, 0], sizes = [2, 32], strides = [1, 1]} : vector<16x32xf32> to vector<2x32xf32>
    %cst_56 = arith.constant dense<0.000000e+00> : vector<2x32xf32>
    %94 = tpu.matmul %91, %61, %cst_56 {dimension_numbers = #tpu.dot_dimension_numbers<[1], [0], [0], [1], [0, 0, 1, 1], [], []>} : vector<2x32xf32>, vector<32x32xf32>, vector<2x32xf32> -> vector<2x32xf32>
    %95 = arith.addf %93, %94 : vector<2x32xf32>
    %96 = math.tanh %95 : vector<2x32xf32>
    %c12_57 = arith.constant 12 : index
    %c0_58 = arith.constant 0 : index
    %97 = vector.load %arg12[%c12_57, %c0_58] : memref<16x32xf32, #tpu.memory_space<vmem>>, vector<2x32xf32>
    tpu.vector_store %arg12[%c12_57, %c0_58], %96 {strides = array<i32>} : memref<16x32xf32, #tpu.memory_space<vmem>>, vector<2x32xf32>,
    %98 = vector.extract_strided_slice %60 {offsets = [14, 0], sizes = [2, 32], strides = [1, 1]} : vector<16x32xf32> to vector<2x32xf32>
    %cst_59 = arith.constant dense<0.000000e+00> : vector<2x32xf32>
    %99 = tpu.matmul %96, %61, %cst_59 {dimension_numbers = #tpu.dot_dimension_numbers<[1], [0], [0], [1], [0, 0, 1, 1], [], []>} : vector<2x32xf32>, vector<32x32xf32>, vector<2x32xf32> -> vector<2x32xf32>
    %100 = arith.addf %98, %99 : vector<2x32xf32>
    %101 = math.tanh %100 : vector<2x32xf32>
    %c14_60 = arith.constant 14 : index
    %c0_61 = arith.constant 0 : index
    %102 = vector.load %arg12[%c14_60, %c0_61] : memref<16x32xf32, #tpu.memory_space<vmem>>, vector<2x32xf32>
    tpu.vector_store %arg12[%c14_60, %c0_61], %101 {strides = array<i32>} : memref<16x32xf32, #tpu.memory_space<vmem>>, vector<2x32xf32>,
    %c0_62 = arith.constant 0 : index
    %c0_63 = arith.constant 0 : index
    %103 = vector.load %arg12[%c0_62, %c0_63] : memref<16x32xf32, #tpu.memory_space<vmem>>, vector<16x32xf32>
    %c0_64 = arith.constant 0 : index
    %c0_65 = arith.constant 0 : index
    %104 = vector.load %arg8[%c0_64, %c0_65] : memref<32x8xf32, #tpu.memory_space<vmem>>, vector<32x8xf32>
    %cst_66 = arith.constant dense<0.000000e+00> : vector<16x8xf32>
    %105 = tpu.matmul %103, %104, %cst_66 {dimension_numbers = #tpu.dot_dimension_numbers<[1], [0], [0], [1], [0, 0, 1, 1], [], []>} : vector<16x32xf32>, vector<32x8xf32>, vector<16x8xf32> -> vector<16x8xf32>
    %c0_67 = arith.constant 0 : index
    %c0_68 = arith.constant 0 : index
    %106 = vector.load %arg9[%c0_67, %c0_68] : memref<1x8xf32, #tpu.memory_space<vmem>>, vector<1x8xf32>
    %107 = vector.broadcast %106 : vector<1x8xf32> to vector<16x8xf32>
    %108 = arith.addf %105, %107 : vector<16x8xf32>
    %c0_69 = arith.constant 0 : index
    %c0_70 = arith.constant 0 : index
    %109 = vector.load %arg10[%c0_69, %c0_70] : memref<16x8xf32, #tpu.memory_space<vmem>>, vector<16x8xf32>
    tpu.vector_store %arg10[%c0_69, %c0_70], %108 {strides = array<i32>} : memref<16x8xf32, #tpu.memory_space<vmem>>, vector<16x8xf32>,
    return
  }
}

</mosaic_0001>

<bundles_post_ra>
// kernel: tpu_custom_call.1
= control target key start
LH: loop header
LB: loop body
LE: loop exit
PB: predicated region body
PF: predicated region fallthrough
CT: control target
= control target key end

     0   :  { %15 = vsyncpa [#allocation5], 0  ;;  %s2575_s0 = inlined_call_operand.vmem [shape: s32[16,1], index: 0, kind: input, shape index: {}]   ;;  %s2576_s1 = inlined_call_operand.hbm [shape: f32[8,16], index: 1, kind: input, shape index: {}]   ;;  %s2577_s2 = inlined_call_operand.hbm [shape: f32[16,32], index: 2, kind: input, shape index: {}]   ;;  %s2578_s3 = inlined_call_operand.vmem [shape: f32[32,32], index: 3, kind: input, shape index: {}]   ;;  %s2579_s4 = inlined_call_operand.hbm [shape: f32[1,32], index: 4, kind: input, shape index: {}]   ;;  %s2580_s5 = inlined_call_operand.vmem [shape: f32[32,32], index: 5, kind: input, shape index: {}]   ;;  %s2581_s6 = inlined_call_operand.hbm [shape: f32[32,32], index: 6, kind: input, shape index: {}]   ;;  %s2582_s7 = inlined_call_operand.vmem [shape: f32[1,32], index: 7, kind: input, shape index: {}]   ;;  %s2583_s8 = inlined_call_operand.vmem [shape: f32[32,8], index: 8, kind: input, shape index: {}]   ;;  %s2584_s9 = inlined_call_operand.vmem [shape: f32[1,8], index: 9, kind: input, shape index: {}]   ;;  %s2585_s10 = inlined_call_operand.vmem [shape: f32[16,8], index: 10, kind: output, shape index: {}]  }
   0x1   :  { %16 = vsyncpa [#allocation7], 0 }
   0x2   :  { %17 = vsyncpa [#allocation10], 0  ;;  %s2209_s13 = smov [#allocation6]  }
   0x3   :  { %s35_s14 = sshll.u32 %s2209_s13, 4  ;;  %s36_s14 = int_to_ptr.vmem [resolvable:$true] %s35_s14 }
   0x4   :  { %s2131_s15 = scalar_lea.vmem %s36_s14, 256  ;;  %p2136_p1 = scmp.lt.s32.totalorder %s36_s14, %s36_s14 }
   0x5   :  { %p2132_p0 = scmp.ne.s32.totalorder %s36_s14, %s2131_s15  ;;  %p2137_p2 = scmp.lt.s32.totalorder %s2131_s15, %s2131_s15 }
   0x7   :  { %p2138_p3 = por %p2137_p2, %p2136_p1 }
   0x9   :  { %p2139_p4 = pnand %p2138_p3, %p2132_p0 }
   0xb   :  { %2142 = shalt.err (!%p2139_p4)
}
   0xc   :  { %s2210_s16 = smov 128   ;;  %s2211_s17 = smov 8  }
   0xd   :  { %41 = dma.hbm_to_vmem [thread:$0]  %s2577_s2, 256, %s36_s14, [#allocation7], %s2210_s16, %s2210_s16, %s2211_s17  }
   0xe   :  { %s2212_s20 = smov [#allocation4]   ;;  %s2213_s22 = smov [#allocation8]  }
   0xf   :  { %s26_s21 = sshll.u32 %s2212_s20, 4  ;;  %s50_s23 = sshll.u32 %s2213_s22, 4  ;;  %s27_s21 = int_to_ptr.vmem [resolvable:$true] %s26_s21  ;;  %s51_s23 = int_to_ptr.vmem [resolvable:$true] %s50_s23 }
  0x10   :  { %s2151_s24 = scalar_lea.vmem %s27_s21, 128  ;;  %p2156_p6 = scmp.lt.s32.totalorder %s27_s21, %s27_s21 }
  0x11   :  { %p2152_p5 = scmp.ne.s32.totalorder %s27_s21, %s2151_s24  ;;  %p2157_p7 = scmp.lt.s32.totalorder %s2151_s24, %s2151_s24 }
  0x13   :  { %p2158_p8 = por %p2157_p7, %p2156_p6 }
  0x15   :  { %p2159_p9 = pnand %p2158_p8, %p2152_p5 }
  0x17   :  { %2162 = shalt.err (!%p2159_p9)
}
  0x18   :  { %29 = dma.hbm_to_vmem [thread:$0]  %s2576_s1, 128, %s27_s21, [#allocation5]  }
  0x19   :  { %s2171_s27 = scalar_lea.vmem %s51_s23, 16  ;;  %s2175_s2 = scalar_lea.vmem %s51_s23, 32 }
  0x1a   :  { %p2172_p10 = scmp.ne.s32.totalorder %s51_s23, %s2171_s27  ;;  %p2176_p11 = scmp.lt.s32.totalorder %s51_s23, %s51_s23 }
  0x1b   :  { %p2177_p12 = scmp.lt.s32.totalorder %s2175_s2, %s2171_s27 }
  0x1d   :  { %p2178_p13 = por %p2177_p12, %p2176_p11 }
  0x1f   :  { %p2179_p0 = pnand %p2178_p13, %p2172_p10 }
  0x21   :  { %2182 = shalt.err (!%p2179_p0)
}
  0x22   :  { %53 = dma.hbm_to_vmem [thread:$0]  %s2579_s4, 16, %s51_s23, [#allocation7]  }
  0x23   :  { %s2214_s30 = smov [#allocation9]  }
  0x24   :  { %s61_s11 = sshll.u32 %s2214_s30, 4  ;;  %s62_s11 = int_to_ptr.vmem [resolvable:$true] %s61_s11 }
  0x25   :  { %s2191_s12 = scalar_lea.vmem %s62_s11, 512  ;;  %p2196_p2 = scmp.lt.s32.totalorder %s62_s11, %s62_s11 }
  0x26   :  { %p2192_p1 = scmp.ne.s32.totalorder %s62_s11, %s2191_s12  ;;  %p2197_p3 = scmp.lt.s32.totalorder %s2191_s12, %s2191_s12 }
  0x28   :  { %p2198_p4 = por %p2197_p3, %p2196_p2 }
  0x2a   :  { %p2199_p5 = pnand %p2198_p4, %p2192_p1 }
  0x2c   :  { %2202 = shalt.err (!%p2199_p5)
}
  0x2d   :  { %67 = dma.hbm_to_vmem [thread:$0]  %s2581_s6, 512, %s62_s11, [#allocation10], %s2210_s16, %s2210_s16, %s2211_s17  }
  0x2e   :  { %2203 = dma.done.wait [#allocation5], 128  }
  0x2f   :  { %2204 = vsyncadd [#allocation5], 4294967168 }
  0x30   :  { %2205 = dma.done.wait [#allocation7], 272  }
  0x31   :  { %2206 = vsyncadd [#allocation7], 4294967024 }
  0x32   :  { %2207 = dma.done.wait [#allocation10], 512  }
  0x33   :  { %2208 = vsyncadd [#allocation10], 4294966784  ;;  %v2215_v0 = vmov 0   ;;  %v88_v1 = vld [vmem:[%s2575_s0] sm:$0xff]  ;;  %v89_v3 = vld [vmem:[%s2575_s0 + $0x8] sm:$0xff]  ;;  %v2216_v4 = vmov 0.0   ;;  %v86_v5 = vlaneseq }
  0x34   :  { %2090 = vset.pattern.permute.xlu0 %v2215_v0  ;;  %v102_v2 = vld [vmem:[#allocation4] sm:$0xff]  ;;  %vm103_vm0 = vcmask 64512   ;;  %v2303_v10 = vld [vmem:[%s2578_s3 + $0x18] sm:$0xff]  ;;  %v186_v12 = vld [vmem:[#allocation6 + $0x8] sm:$0xff]  ;;  %vm2217_vm3 = vmmov 0   ;;  %vm194_vm4 = vcmask 130048  }
  0x35   :  { %91 = vperm.xlu0 %2090, %v88_v1   ;;  %1871 = vmatprep.subr.mxu0 %v102_v2  ;;  %v87_v6 = vand.u32 127, %v86_v5  ;;  %v2312_v13 = vld [vmem:[%s2578_s3 + $0x10] sm:$0xff]  ;;  %v185_v14 = vld [vmem:[#allocation6] sm:$0xff]  ;;  %v2326_v16 = vld [vmem:[%s2578_s3] sm:$0xff]  ;;  %vm356_vm5 = vcmask 254976   ;;  %vm280_vm6 = vcmask 261120  }
  0x36   :  { %1872 = vmatpush3.msra.mxu0 %v102_v2  ;;  %1876 = vmatprep.subr.mxu1 %v186_v12  ;;  %v2319_v15 = vld [vmem:[%s2578_s3 + $0x8] sm:$0xff]  ;;  %v1749_v21 = vld [vmem:[#allocation8] ss:$0 sm:$0xff]  ;;  %vm436_vm7 = vcmask 257026   ;;  %vm517_vm8 = vcmask 259076   ;;  %vm598_vm9 = vcmask 261126  }
  0x37   :  { %1883 = vmatprep.subr.mxu0 %v2216_v4  ;;  %1877 = vmatpush3.msra.mxu1 %v186_v12  ;;  %v921_v63 = vld [vmem:[%s2580_s5 + $0x18] sm:$0xff]  ;;  %v920_v0 = vld [vmem:[%s2580_s5 + $0x10] sm:$0xff]  ;;  %v919_v2 = vld [vmem:[%s2580_s5 + $0x8] sm:$0xff] }
  0x38   :  { %1878 = vmatprep.subr.mxu1 %v185_v14  ;;  %v2431_v1 = vld [vmem:[#allocation9 + $0x18] sm:$0xff]  ;;  %v2440_v5 = vld [vmem:[#allocation9 + $0x8] sm:$0xff] }
  0x39   :  { %94 = vperm.xlu0 %2090, %v89_v3   ;;  %1879 = vmatpush3.msra.mxu1 %v185_v14  ;;  %v2437_v3 = vld [vmem:[#allocation9 + $0x10] sm:$0xff] }
  0x3a   :  { %1894 = vmatprep.subr.mxu1 %v2216_v4 }
  0xb0   :  { %v92_v7 = vpop.permute.xlu0 %91 }
  0xb1   :  { %vm96_vm1 = vcmp.eq.s32.totalorder %v87_v6, %v92_v7  ;;  %v2449_v7 = vld [vmem:[#allocation9] sm:$0xff] }
  0xb2   :  { %v1745_v8 = vsel %vm96_vm1, 1.0, %v2216_v4 }
  0xb3   :  { %1873 = vmatprep.mubr.msk.f32.mxu0 %vm103_vm0, %v1745_v8 }
  0xb4   :  { %v95_v9 = vpop.permute.xlu0 %94 }
  0xb5   :  { %vm97_vm2 = vcmp.eq.s32.totalorder %v87_v6, %v95_v9  ;;  %v918_v6 = vld [vmem:[%s2580_s5] sm:$0xff] }
  0xb6   :  { %v1746_v11 = vsel %vm97_vm2, 1.0, %v2216_v4 }
  0xb7   :  { %1874 = vmatmul.mubr.msk.f32.vlgmr.msra.gmra.mxu0 %vm103_vm0, %v1746_v11 }
  0xb8   :  { %1884 = vmatpush3.msra.mxu0 %v2303_v10  ;;  %1891 = vmatprep.mubr.msk.f32.mxu0 %vm2217_vm3, %v2216_v4 }
  0xb9   :  { %1885 = vmatprep.subr.mxu0 %v2216_v4 }
  0xba   :  { %1886 = vmatpush3.msra.mxu0 %v2312_v13 }
  0xbb   :  { %1887 = vmatprep.subr.mxu0 %v2216_v4 }
  0xbc   :  { %1888 = vmatpush3.msra.mxu0 %v2319_v15 }
  0xbd   :  { %1889 = vmatprep.subr.mxu0 %v2216_v4 }
  0xbe   :  { %1890 = vmatpush3.msra.mxu0 %v2326_v16 }
  0xbf   :  { %1892 = vmatmul.mubr.f32.vlgmr.msra.gmra.mxu0 %v2216_v4  ;;  %1905 = vmatprep.subr.mxu0 %v2216_v4 }
  0xc0   :  { %1906 = vmatpush3.msra.mxu0 %v2303_v10  ;;  %1913 = vmatprep.mubr.msk.f32.mxu0 %vm2217_vm3, %v2216_v4 }
  0xc1   :  { %1907 = vmatprep.subr.mxu0 %v2216_v4 }
  0xc2   :  { %1908 = vmatpush3.msra.mxu0 %v2312_v13 }
  0xc3   :  { %1909 = vmatprep.subr.mxu0 %v2216_v4 }
  0xc4   :  { %1910 = vmatpush3.msra.mxu0 %v2319_v15 }
  0xc5   :  { %1911 = vmatprep.subr.mxu0 %v2216_v4 }
  0xc6   :  { %1912 = vmatpush3.msra.mxu0 %v2326_v16 }
  0xc7   :  { %1927 = vmatprep.subr.mxu0 %v2216_v4 }
 0x177   :  { %v1875_v17 = vpop.f32.mrf.mxu0 }
 0x179   :  { %v176_v18 = vpop.f32.mrf.mxu0 }
 0x17a   :  { %1880 = vmatprep.mubr.msk.f32.mxu1 %vm194_vm4, %v176_v18 }
 0x17b   :  { %1881 = vmatmul.mubr.msk.f32.vlgmr.msra.gmra.mxu1 %vm194_vm4, %v1875_v17 }
 0x17c   :  { %1895 = vmatpush3.msra.mxu1 %v2303_v10  ;;  %1902 = vmatprep.mubr.msk.f32.mxu1 %vm2217_vm3, %v2216_v4 }
 0x17d   :  { %1896 = vmatprep.subr.mxu1 %v2216_v4 }
 0x17e   :  { %1897 = vmatpush3.msra.mxu1 %v2312_v13 }
 0x17f   :  { %1898 = vmatprep.subr.mxu1 %v2216_v4  ;;  %v350_v19 = vpop.f32.mrf.mxu0 }
 0x180   :  { %1899 = vmatpush3.msra.mxu1 %v2319_v15 }
 0x181   :  { %1900 = vmatprep.subr.mxu1 %v2216_v4  ;;  %v1893_v20 = vpop.f32.mrf.mxu0 }
 0x182   :  { %1901 = vmatpush3.msra.mxu1 %v2326_v16 }
 0x183   :  { %1916 = vmatprep.subr.mxu1 %v2216_v4 }
 0x23b   :  { %v1882_v22 = vpop.f32.mrf.mxu1 }
 0x23c   :  { %v2354_v23 = vadd.f32 %v1882_v22, %v1749_v21 }
 0x23d   :  { %v267_v24 = vpop.f32.mrf.mxu1 }
 0x23e   :  { %v268_v25 = vadd.f32 %v1749_v21, %v267_v24 }
 0x240   :  { %v354_v26 = vadd.f32 %v350_v19, %v268_v25 }
 0x242   :  { %2091 = vtanh.f32 %v354_v26 }
 0x24f   :  { %v2092_v27 = vpop.eup %2091 }
 0x250   :  { %357 = vst.msk [vmem:[#allocation2] sm:$0x3] %vm356_vm5, %v2092_v27  ;;  %1903 = vmatmul.mubr.msk.f32.vlgmr.msra.gmra.mxu1 %vm280_vm6, %v2092_v27 }
 0x251   :  { %1917 = vmatpush3.msra.mxu1 %v2303_v10  ;;  %1924 = vmatprep.mubr.msk.f32.mxu1 %vm2217_vm3, %v2216_v4 }
 0x252   :  { %1918 = vmatprep.subr.mxu1 %v2216_v4 }
 0x253   :  { %1919 = vmatpush3.msra.mxu1 %v2312_v13 }
 0x254   :  { %1920 = vmatprep.subr.mxu1 %v2216_v4 }
 0x255   :  { %1921 = vmatpush3.msra.mxu1 %v2319_v15 }
 0x256   :  { %1922 = vmatprep.subr.mxu1 %v2216_v4 }
 0x257   :  { %1923 = vmatpush3.msra.mxu1 %v2326_v16 }
 0x258   :  { %1938 = vmatprep.subr.mxu1 %v2216_v4 }
 0x310   :  { %v427_v28 = vpop.f32.mrf.mxu1 }
 0x311   :  { %v432_v29 = vrot.slane %v427_v28, 6 }
 0x312   :  { %v1904_v30 = vpop.f32.mrf.mxu1 }
 0x313   :  { %v434_v31 = vadd.f32 %v432_v29, %v268_v25 }
 0x315   :  { %2093 = vtanh.f32 %v434_v31 }
 0x322   :  { %v2094_v32 = vpop.eup %2093 }
 0x323   :  { %437 = vst.msk [vmem:[#allocation2] sm:$0xc] %vm436_vm7, %v2094_v32  ;;  %v439_v33 = vrot.slane %v2094_v32, 2 }
 0x325   :  { %1914 = vmatmul.mubr.msk.f32.vlgmr.msra.gmra.mxu0 %vm280_vm6, %v439_v33 }
 0x326   :  { %1928 = vmatpush3.msra.mxu0 %v2303_v10  ;;  %1935 = vmatprep.mubr.msk.f32.mxu0 %vm2217_vm3, %v2216_v4 }
 0x327   :  { %1929 = vmatprep.subr.mxu0 %v2216_v4 }
 0x328   :  { %1930 = vmatpush3.msra.mxu0 %v2312_v13 }
 0x329   :  { %1931 = vmatprep.subr.mxu0 %v2216_v4 }
 0x32a   :  { %1932 = vmatpush3.msra.mxu0 %v2319_v15 }
 0x32b   :  { %1933 = vmatprep.subr.mxu0 %v2216_v4 }
 0x32c   :  { %1934 = vmatpush3.msra.mxu0 %v2326_v16 }
 0x32d   :  { %1949 = vmatprep.subr.mxu0 %v2216_v4 }
 0x3e5   :  { %v508_v34 = vpop.f32.mrf.mxu0 }
 0x3e6   :  { %v513_v35 = vrot.slane %v508_v34, 4 }
 0x3e7   :  { %v1915_v36 = vpop.f32.mrf.mxu0 }
 0x3e8   :  { %v515_v37 = vadd.f32 %v513_v35, %v268_v25 }
 0x3ea   :  { %2095 = vtanh.f32 %v515_v37 }
 0x3f7   :  { %v2096_v38 = vpop.eup %2095 }
 0x3f8   :  { %518 = vst.msk [vmem:[#allocation2] sm:$0x30] %vm517_vm8, %v2096_v38  ;;  %v520_v39 = vrot.slane %v2096_v38, 4 }
 0x3fa   :  { %1925 = vmatmul.mubr.msk.f32.vlgmr.msra.gmra.mxu1 %vm280_vm6, %v520_v39 }
 0x3fb   :  { %1939 = vmatpush3.msra.mxu1 %v2303_v10  ;;  %1946 = vmatprep.mubr.msk.f32.mxu1 %vm2217_vm3, %v2216_v4 }
 0x3fc   :  { %1940 = vmatprep.subr.mxu1 %v2216_v4 }
 0x3fd   :  { %1941 = vmatpush3.msra.mxu1 %v2312_v13 }
 0x3fe   :  { %1942 = vmatprep.subr.mxu1 %v2216_v4 }
 0x3ff   :  { %1943 = vmatpush3.msra.mxu1 %v2319_v15 }
 0x400   :  { %1944 = vmatprep.subr.mxu1 %v2216_v4 }
 0x401   :  { %1945 = vmatpush3.msra.mxu1 %v2326_v16 }
 0x402   :  { %1960 = vmatprep.subr.mxu1 %v2216_v4 }
 0x4ba   :  { %v589_v40 = vpop.f32.mrf.mxu1 }
 0x4bb   :  { %v594_v41 = vrot.slane %v589_v40, 2 }
 0x4bc   :  { %v1926_v42 = vpop.f32.mrf.mxu1 }
 0x4bd   :  { %v596_v43 = vadd.f32 %v594_v41, %v268_v25 }
 0x4bf   :  { %2097 = vtanh.f32 %v596_v43 }
 0x4cc   :  { %v2098_v44 = vpop.eup %2097 }
 0x4cd   :  { %599 = vst.msk [vmem:[#allocation2] sm:$0xc0] %vm598_vm9, %v2098_v44  ;;  %v601_v45 = vrot.slane %v2098_v44, 6 }
 0x4cf   :  { %1936 = vmatmul.mubr.msk.f32.vlgmr.msra.gmra.mxu0 %vm280_vm6, %v601_v45 }
 0x4d0   :  { %1950 = vmatpush3.msra.mxu0 %v2303_v10  ;;  %1957 = vmatprep.mubr.msk.f32.mxu0 %vm2217_vm3, %v2216_v4 }
 0x4d1   :  { %1951 = vmatprep.subr.mxu0 %v2216_v4 }
 0x4d2   :  { %1952 = vmatpush3.msra.mxu0 %v2312_v13 }
 0x4d3   :  { %1953 = vmatprep.subr.mxu0 %v2216_v4 }
 0x4d4   :  { %1954 = vmatpush3.msra.mxu0 %v2319_v15  ;;  %v916_v56 = vld [vmem:[#allocation2] sm:$0xff] }
 0x4d5   :  { %1955 = vmatprep.subr.mxu0 %v2216_v4 }
 0x4d6   :  { %1956 = vmatpush3.msra.mxu0 %v2326_v16 }
 0x4d7   :  { %1971 = vmatprep.subr.mxu0 %v921_v63 }
 0x58f   :  { %v670_v46 = vpop.f32.mrf.mxu0 }
 0x590   :  { %v674_v47 = vadd.f32 %v670_v46, %v2354_v23 }
 0x591   :  { %v1937_v48 = vpop.f32.mrf.mxu0 }
 0x592   :  { %2099 = vtanh.f32 %v674_v47 }
 0x59f   :  { %v2100_v49 = vpop.eup %2099 }
 0x5a0   :  { %676 = vst.msk [vmem:[#allocation2 + $0x8] sm:$0x3] %vm356_vm5, %v2100_v49  ;;  %1947 = vmatmul.mubr.msk.f32.vlgmr.msra.gmra.mxu1 %vm280_vm6, %v2100_v49 }
 0x5a1   :  { %1961 = vmatpush3.msra.mxu1 %v2303_v10  ;;  %1968 = vmatprep.mubr.msk.f32.mxu1 %vm2217_vm3, %v2216_v4 }
 0x5a2   :  { %1962 = vmatprep.subr.mxu1 %v2216_v4 }
 0x5a3   :  { %1963 = vmatpush3.msra.mxu1 %v2312_v13 }
 0x5a4   :  { %1964 = vmatprep.subr.mxu1 %v2216_v4 }
 0x5a5   :  { %1965 = vmatpush3.msra.mxu1 %v2319_v15 }
 0x5a6   :  { %1966 = vmatprep.subr.mxu1 %v2216_v4 }
 0x5a7   :  { %1967 = vmatpush3.msra.mxu1 %v2326_v16  ;;  %v1759_v16 = vld [vmem:[%s2582_s7] ss:$0 sm:$0xff] }
 0x5a8   :  { %1982 = vmatprep.subr.mxu1 %v2216_v4 }
 0x660   :  { %v746_v50 = vpop.f32.mrf.mxu1 }
 0x661   :  { %v751_v51 = vrot.slane %v746_v50, 6 }
 0x662   :  { %v1948_v52 = vpop.f32.mrf.mxu1 }
 0x663   :  { %v753_v53 = vadd.f32 %v751_v51, %v2354_v23 }
 0x665   :  { %2101 = vtanh.f32 %v753_v53 }
 0x672   :  { %v2102_v54 = vpop.eup %2101 }
 0x673   :  { %755 = vst.msk [vmem:[#allocation2 + $0x8] sm:$0xc] %vm436_vm7, %v2102_v54  ;;  %v757_v55 = vrot.slane %v2102_v54, 2 }
 0x675   :  { %1958 = vmatmul.mubr.msk.f32.vlgmr.msra.gmra.mxu0 %vm280_vm6, %v757_v55 }
 0x676   :  { %1979 = vmatprep.mubr.msk.f32.mxu0 %vm280_vm6, %v916_v56  ;;  %1972 = vmatpush3.msra.mxu0 %v921_v63 }
 0x677   :  { %1973 = vmatprep.subr.mxu0 %v920_v0 }
 0x678   :  { %1974 = vmatpush3.msra.mxu0 %v920_v0 }
 0x679   :  { %1975 = vmatprep.subr.mxu0 %v919_v2 }
 0x67a   :  { %1976 = vmatpush3.msra.mxu0 %v919_v2 }
 0x67b   :  { %1977 = vmatprep.subr.mxu0 %v918_v6 }
 0x67c   :  { %1978 = vmatpush3.msra.mxu0 %v918_v6 }
 0x67d   :  { %1993 = vmatprep.subr.mxu0 %v2216_v4 }
 0x735   :  { %v826_v57 = vpop.f32.mrf.mxu0 }
 0x736   :  { %v831_v58 = vrot.slane %v826_v57, 4  ;;  %v1647_v57 = vld [vmem:[%s2583_s8 + $0x18] sm:$0xff] }
 0x737   :  { %v1959_v59 = vpop.f32.mrf.mxu0 }
 0x738   :  { %v833_v60 = vadd.f32 %v831_v58, %v2354_v23  ;;  %v1646_v58 = vld [vmem:[%s2583_s8 + $0x10] sm:$0xff]  ;;  %v1645_v59 = vld [vmem:[%s2583_s8 + $0x8] sm:$0xff] }
 0x73a   :  { %2103 = vtanh.f32 %v833_v60  ;;  %v1644_v60 = vld [vmem:[%s2583_s8] sm:$0xff] }
 0x747   :  { %v2104_v61 = vpop.eup %2103 }
 0x748   :  { %835 = vst.msk [vmem:[#allocation2 + $0x8] sm:$0x30] %vm517_vm8, %v2104_v61  ;;  %v837_v62 = vrot.slane %v2104_v61, 4 }
 0x74a   :  { %1969 = vmatmul.mubr.msk.f32.vlgmr.msra.gmra.mxu1 %vm280_vm6, %v837_v62 }
 0x74b   :  { %1990 = vmatprep.mubr.msk.f32.mxu1 %vm2217_vm3, %v2216_v4  ;;  %1983 = vmatpush3.msra.mxu1 %v2431_v1 }
 0x74c   :  { %1984 = vmatprep.subr.mxu1 %v2216_v4 }
 0x74d   :  { %1985 = vmatpush3.msra.mxu1 %v2437_v3 }
 0x74e   :  { %1986 = vmatprep.subr.mxu1 %v2216_v4 }
 0x74f   :  { %1987 = vmatpush3.msra.mxu1 %v2440_v5 }
 0x750   :  { %1988 = vmatprep.subr.mxu1 %v2216_v4 }
 0x751   :  { %1989 = vmatpush3.msra.mxu1 %v2449_v7 }
 0x752   :  { %1991 = vmatmul.mubr.f32.vlgmr.msra.gmra.mxu1 %v2216_v4  ;;  %2004 = vmatprep.subr.mxu1 %v2216_v4 }
 0x753   :  { %2005 = vmatpush3.msra.mxu1 %v2431_v1  ;;  %2012 = vmatprep.mubr.msk.f32.mxu1 %vm2217_vm3, %v2216_v4 }
 0x754   :  { %2006 = vmatprep.subr.mxu1 %v2216_v4 }
 0x755   :  { %2007 = vmatpush3.msra.mxu1 %v2437_v3 }
 0x756   :  { %2008 = vmatprep.subr.mxu1 %v2216_v4 }
 0x757   :  { %2009 = vmatpush3.msra.mxu1 %v2440_v5 }
 0x758   :  { %2010 = vmatprep.subr.mxu1 %v2216_v4 }
 0x759   :  { %2011 = vmatpush3.msra.mxu1 %v2449_v7 }
 0x75a   :  { %2026 = vmatprep.subr.mxu1 %v2216_v4 }
 0x80a   :  { %v906_v8 = vpop.f32.mrf.mxu1 }
 0x80b   :  { %v911_v9 = vrot.slane %v906_v8, 2 }
 0x80c   :  { %v1970_v10 = vpop.f32.mrf.mxu1 }
 0x80d   :  { %v913_v11 = vadd.f32 %v911_v9, %v2354_v23 }
 0x80f   :  { %2105 = vtanh.f32 %v913_v11 }
 0x812   :  { %v1080_v14 = vpop.f32.mrf.mxu1 }
 0x814   :  { %v1992_v15 = vpop.f32.mrf.mxu1 }
 0x81c   :  { %v2106_v12 = vpop.eup %2105 }
 0x81d   :  { %915 = vst.msk [vmem:[#allocation2 + $0x8] sm:$0xc0] %vm598_vm9, %v2106_v12 }
 0x824   :  { %v917_v13 = vld [vmem:[#allocation2 + $0x8] sm:$0xff] }
 0x825   :  { %1980 = vmatmul.mubr.msk.f32.vlgmr.msra.gmra.mxu0 %vm280_vm6, %v917_v13 }
 0x826   :  { %1994 = vmatpush3.msra.mxu0 %v2431_v1  ;;  %2001 = vmatprep.mubr.msk.f32.mxu0 %vm2217_vm3, %v2216_v4 }
 0x827   :  { %1995 = vmatprep.subr.mxu0 %v2216_v4 }
 0x828   :  { %1996 = vmatpush3.msra.mxu0 %v2437_v3 }
 0x829   :  { %1997 = vmatprep.subr.mxu0 %v2216_v4 }
 0x82a   :  { %1998 = vmatpush3.msra.mxu0 %v2440_v5 }
 0x82b   :  { %1999 = vmatprep.subr.mxu0 %v2216_v4 }
 0x82c   :  { %2000 = vmatpush3.msra.mxu0 %v2449_v7 }
 0x82d   :  { %2015 = vmatprep.subr.mxu0 %v2216_v4 }
 0x8e5   :  { %v1981_v17 = vpop.f32.mrf.mxu0 }
 0x8e6   :  { %v2481_v18 = vadd.f32 %v1981_v17, %v1759_v16 }
 0x8e7   :  { %v1001_v19 = vpop.f32.mrf.mxu0 }
 0x8e8   :  { %v1002_v20 = vadd.f32 %v1759_v16, %v1001_v19 }
 0x8ea   :  { %v1084_v21 = vadd.f32 %v1080_v14, %v1002_v20 }
 0x8ec   :  { %2107 = vtanh.f32 %v1084_v21 }
 0x8f9   :  { %v2108_v22 = vpop.eup %2107 }
 0x8fa   :  { %1086 = vst.msk [vmem:[#allocation3] sm:$0x3] %vm356_vm5, %v2108_v22  ;;  %2002 = vmatmul.mubr.msk.f32.vlgmr.msra.gmra.mxu0 %vm280_vm6, %v2108_v22 }
 0x8fb   :  { %2016 = vmatpush3.msra.mxu0 %v2431_v1  ;;  %2023 = vmatprep.mubr.msk.f32.mxu0 %vm2217_vm3, %v2216_v4 }
 0x8fc   :  { %2017 = vmatprep.subr.mxu0 %v2216_v4 }
 0x8fd   :  { %2018 = vmatpush3.msra.mxu0 %v2437_v3 }
 0x8fe   :  { %2019 = vmatprep.subr.mxu0 %v2216_v4 }
 0x8ff   :  { %2020 = vmatpush3.msra.mxu0 %v2440_v5 }
 0x900   :  { %2021 = vmatprep.subr.mxu0 %v2216_v4 }
 0x901   :  { %2022 = vmatpush3.msra.mxu0 %v2449_v7 }
 0x902   :  { %2037 = vmatprep.subr.mxu0 %v2216_v4 }
 0x9ba   :  { %v1156_v23 = vpop.f32.mrf.mxu0 }
 0x9bb   :  { %v1161_v24 = vrot.slane %v1156_v23, 6 }
 0x9bc   :  { %v2003_v25 = vpop.f32.mrf.mxu0 }
 0x9bd   :  { %v1163_v26 = vadd.f32 %v1161_v24, %v1002_v20 }
 0x9bf   :  { %2109 = vtanh.f32 %v1163_v26 }
 0x9cc   :  { %v2110_v27 = vpop.eup %2109 }
 0x9cd   :  { %1165 = vst.msk [vmem:[#allocation3] sm:$0xc] %vm436_vm7, %v2110_v27  ;;  %v1167_v28 = vrot.slane %v2110_v27, 2 }
 0x9cf   :  { %2013 = vmatmul.mubr.msk.f32.vlgmr.msra.gmra.mxu1 %vm280_vm6, %v1167_v28 }
 0x9d0   :  { %2027 = vmatpush3.msra.mxu1 %v2431_v1  ;;  %2034 = vmatprep.mubr.msk.f32.mxu1 %vm2217_vm3, %v2216_v4 }
 0x9d1   :  { %2028 = vmatprep.subr.mxu1 %v2216_v4 }
 0x9d2   :  { %2029 = vmatpush3.msra.mxu1 %v2437_v3 }
 0x9d3   :  { %2030 = vmatprep.subr.mxu1 %v2216_v4 }
 0x9d4   :  { %2031 = vmatpush3.msra.mxu1 %v2440_v5 }
 0x9d5   :  { %2032 = vmatprep.subr.mxu1 %v2216_v4 }
 0x9d6   :  { %2033 = vmatpush3.msra.mxu1 %v2449_v7 }
 0x9d7   :  { %2048 = vmatprep.subr.mxu1 %v2216_v4 }
 0xa8f   :  { %v1236_v29 = vpop.f32.mrf.mxu1 }
 0xa90   :  { %v1241_v30 = vrot.slane %v1236_v29, 4 }
 0xa91   :  { %v2014_v31 = vpop.f32.mrf.mxu1 }
 0xa92   :  { %v1243_v32 = vadd.f32 %v1241_v30, %v1002_v20 }
 0xa94   :  { %2111 = vtanh.f32 %v1243_v32 }
 0xaa1   :  { %v2112_v33 = vpop.eup %2111 }
 0xaa2   :  { %1245 = vst.msk [vmem:[#allocation3] sm:$0x30] %vm517_vm8, %v2112_v33  ;;  %v1247_v34 = vrot.slane %v2112_v33, 4 }
 0xaa4   :  { %2024 = vmatmul.mubr.msk.f32.vlgmr.msra.gmra.mxu0 %vm280_vm6, %v1247_v34 }
 0xaa5   :  { %2038 = vmatpush3.msra.mxu0 %v2431_v1  ;;  %2045 = vmatprep.mubr.msk.f32.mxu0 %vm2217_vm3, %v2216_v4 }
 0xaa6   :  { %2039 = vmatprep.subr.mxu0 %v2216_v4 }
 0xaa7   :  { %2040 = vmatpush3.msra.mxu0 %v2437_v3 }
 0xaa8   :  { %2041 = vmatprep.subr.mxu0 %v2216_v4 }
 0xaa9   :  { %2042 = vmatpush3.msra.mxu0 %v2440_v5 }
 0xaaa   :  { %2043 = vmatprep.subr.mxu0 %v2216_v4 }
 0xaab   :  { %2044 = vmatpush3.msra.mxu0 %v2449_v7 }
 0xaac   :  { %2059 = vmatprep.subr.mxu0 %v2216_v4 }
 0xb64   :  { %v1316_v35 = vpop.f32.mrf.mxu0 }
 0xb65   :  { %v1321_v36 = vrot.slane %v1316_v35, 2 }
 0xb66   :  { %v2025_v37 = vpop.f32.mrf.mxu0 }
 0xb67   :  { %v1323_v38 = vadd.f32 %v1321_v36, %v1002_v20 }
 0xb69   :  { %2113 = vtanh.f32 %v1323_v38 }
 0xb76   :  { %v2114_v39 = vpop.eup %2113 }
 0xb77   :  { %1325 = vst.msk [vmem:[#allocation3] sm:$0xc0] %vm598_vm9, %v2114_v39  ;;  %v1327_v40 = vrot.slane %v2114_v39, 6 }
 0xb79   :  { %2035 = vmatmul.mubr.msk.f32.vlgmr.msra.gmra.mxu1 %vm280_vm6, %v1327_v40 }
 0xb7a   :  { %2049 = vmatpush3.msra.mxu1 %v2431_v1  ;;  %2056 = vmatprep.mubr.msk.f32.mxu1 %vm2217_vm3, %v2216_v4 }
 0xb7b   :  { %2050 = vmatprep.subr.mxu1 %v2216_v4 }
 0xb7c   :  { %2051 = vmatpush3.msra.mxu1 %v2437_v3 }
 0xb7d   :  { %2052 = vmatprep.subr.mxu1 %v2216_v4 }
 0xb7e   :  { %2053 = vmatpush3.msra.mxu1 %v2440_v5  ;;  %v1642_v51 = vld [vmem:[#allocation3] sm:$0xff] }
 0xb7f   :  { %2054 = vmatprep.subr.mxu1 %v2216_v4 }
 0xb80   :  { %2055 = vmatpush3.msra.mxu1 %v2449_v7 }
 0xb81   :  { %2070 = vmatprep.subr.mxu1 %v1647_v57 }
 0xc39   :  { %v1396_v41 = vpop.f32.mrf.mxu1 }
 0xc3a   :  { %v1400_v42 = vadd.f32 %v1396_v41, %v2481_v18 }
 0xc3b   :  { %v2036_v43 = vpop.f32.mrf.mxu1 }
 0xc3c   :  { %2115 = vtanh.f32 %v1400_v42 }
 0xc49   :  { %v2116_v44 = vpop.eup %2115 }
 0xc4a   :  { %1402 = vst.msk [vmem:[#allocation3 + $0x8] sm:$0x3] %vm356_vm5, %v2116_v44  ;;  %2046 = vmatmul.mubr.msk.f32.vlgmr.msra.gmra.mxu0 %vm280_vm6, %v2116_v44 }
 0xc4b   :  { %2060 = vmatpush3.msra.mxu0 %v2431_v1  ;;  %2067 = vmatprep.mubr.msk.f32.mxu0 %vm2217_vm3, %v2216_v4 }
 0xc4c   :  { %2061 = vmatprep.subr.mxu0 %v2216_v4 }
 0xc4d   :  { %2062 = vmatpush3.msra.mxu0 %v2437_v3  ;;  %v1769_v3 = vld [vmem:[%s2584_s9] ss:$0 sm:$0xff] }
 0xc4e   :  { %2063 = vmatprep.subr.mxu0 %v2216_v4 }
 0xc4f   :  { %2064 = vmatpush3.msra.mxu0 %v2440_v5 }
 0xc50   :  { %2065 = vmatprep.subr.mxu0 %v2216_v4 }
 0xc51   :  { %2066 = vmatpush3.msra.mxu0 %v2449_v7 }
 0xd0a   :  { %v1472_v45 = vpop.f32.mrf.mxu0 }
 0xd0b   :  { %v1477_v46 = vrot.slane %v1472_v45, 6 }
 0xd0c   :  { %v2047_v47 = vpop.f32.mrf.mxu0 }
 0xd0d   :  { %v1479_v48 = vadd.f32 %v1477_v46, %v2481_v18 }
 0xd0f   :  { %2117 = vtanh.f32 %v1479_v48 }
 0xd1c   :  { %v2118_v49 = vpop.eup %2117 }
 0xd1d   :  { %1481 = vst.msk [vmem:[#allocation3 + $0x8] sm:$0xc] %vm436_vm7, %v2118_v49  ;;  %v1483_v50 = vrot.slane %v2118_v49, 2 }
 0xd1f   :  { %2057 = vmatmul.mubr.msk.f32.vlgmr.msra.gmra.mxu1 %vm280_vm6, %v1483_v50 }
 0xd20   :  { %2078 = vmatprep.mubr.msk.f32.mxu1 %vm280_vm6, %v1642_v51  ;;  %2071 = vmatpush3.msra.mxu1 %v1647_v57 }
 0xd21   :  { %2072 = vmatprep.subr.mxu1 %v1646_v58 }
 0xd22   :  { %2073 = vmatpush3.msra.mxu1 %v1646_v58 }
 0xd23   :  { %2074 = vmatprep.subr.mxu1 %v1645_v59 }
 0xd24   :  { %2075 = vmatpush3.msra.mxu1 %v1645_v59 }
 0xd25   :  { %2076 = vmatprep.subr.mxu1 %v1644_v60 }
 0xd26   :  { %2077 = vmatpush3.msra.mxu1 %v1644_v60 }
 0xddf   :  { %v1552_v52 = vpop.f32.mrf.mxu1 }
 0xde0   :  { %v1557_v53 = vrot.slane %v1552_v52, 4 }
 0xde1   :  { %v2058_v4 = vpop.f32.mrf.mxu1 }
 0xde2   :  { %v1559_v54 = vadd.f32 %v1557_v53, %v2481_v18 }
 0xde4   :  { %2119 = vtanh.f32 %v1559_v54 }
 0xdf1   :  { %v2120_v55 = vpop.eup %2119 }
 0xdf2   :  { %1561 = vst.msk [vmem:[#allocation3 + $0x8] sm:$0x30] %vm517_vm8, %v2120_v55  ;;  %v1563_v56 = vrot.slane %v2120_v55, 4 }
 0xdf4   :  { %2068 = vmatmul.mubr.msk.f32.vlgmr.msra.gmra.mxu0 %vm280_vm6, %v1563_v56 }
 0xeb4   :  { %v1632_v61 = vpop.f32.mrf.mxu0 }
 0xeb5   :  { %v1637_v62 = vrot.slane %v1632_v61, 2 }
 0xeb6   :  { %v2069_v63 = vpop.f32.mrf.mxu0 }
 0xeb7   :  { %v1639_v0 = vadd.f32 %v1637_v62, %v2481_v18 }
 0xeb9   :  { %2121 = vtanh.f32 %v1639_v0 }
 0xec6   :  { %v2122_v1 = vpop.eup %2121 }
 0xec7   :  { %1641 = vst.msk [vmem:[#allocation3 + $0x8] sm:$0xc0] %vm598_vm9, %v2122_v1 }
 0xece   :  { %v1643_v2 = vld [vmem:[#allocation3 + $0x8] sm:$0xff] }
 0xecf   :  { %2079 = vmatmul.mubr.msk.f32.vlgmr.msra.gmra.mxu1 %vm280_vm6, %v1643_v2 }
 0xf8f   :  { %v2080_v5 = vpop.f32.mrf.mxu1 }
 0xf90   :  { %v1733_v6 = vadd.f32 %v2080_v5, %v1769_v3 }
 0xf91   :  { %v1727_v7 = vpop.f32.mrf.mxu1 }
 0xf92   :  { %1737 = vst.msk [vmem:[%s2585_s10 + $0x8] sm:$0xff] %vm103_vm0, %v1733_v6  ;;  %v1728_v8 = vadd.f32 %v1769_v3, %v1727_v7 }
 0xf94   :  { %1736 = vst.msk [vmem:[%s2585_s10] sm:$0xff] %vm103_vm0, %v1728_v8 }
 0xf95   :  { %1742 = vsyncpa [#allocation5], 1 }
 0xf96   :  { %1743 = vsyncpa [#allocation7], 1 }
 0xf97   :  { %1744 = vsyncpa [#allocation10], 1 }

</bundles_post_ra>
